<compile_context>
chip_gen: v7x
topology: tpu7x:2x2x1
jax: 0.10.0
libtpu: 0.0.40
codegen_flags: <defaults>
</compile_context>

<pallas_src>
import jax
import jax.numpy as jnp
from jax.experimental import pallas as pl
from jax.experimental.pallas import tpu as pltpu

EPS = 1e-5


def _conv_bn_relu_add_kernel(x_ref, w_ref, gb_ref, o_ref):
    """One C_out tile: fused conv (both branches) + BN(train) + ReLU + add.

    x_ref  : (C_in*5, N*L)       im2col input (resident across grid steps)
    w_ref  : (2*tile_c, C_in*5)  fused weights (first tile_c rows = k3 branch)
    gb_ref : (2*tile_c, 2)       column 0 = gamma, column 1 = beta (f32)
    o_ref  : (tile_c, N*L)       combined output for this tile
    """
    x = x_ref[...]
    w = w_ref[...]

    # Single MXU matmul covering both branches; f32 accumulation.
    acc = jnp.dot(w, x, preferred_element_type=jnp.float32)      # (2*tile_c, NL)

    # One-pass BN moments over the N*L lane axis (training-mode batch stats,
    # biased variance -- matches PyTorch forward()).  Conv bias is omitted on
    # purpose: a per-channel constant cancels exactly under training-mode BN.
    inv_nl = 1.0 / acc.shape[1]
    mean = jnp.sum(acc, axis=1, keepdims=True) * inv_nl
    sumsq = jnp.sum(acc * acc, axis=1, keepdims=True) * inv_nl
    var = sumsq - mean * mean

    gamma = gb_ref[:, 0:1]
    beta = gb_ref[:, 1:2]
    scale = gamma * jax.lax.rsqrt(var + EPS)                      # g / sqrt(var+eps)
    shift = beta - mean * scale                                   # folded shift

    # BN + ReLU per branch directly from acc slices (no full (2*tile_c, NL)
    # temporary), then add the two branches.
    ct = o_ref.shape[0]
    y3 = jnp.maximum(acc[:ct] * scale[:ct] + shift[:ct], 0.0)
    y5 = jnp.maximum(acc[ct:] * scale[ct:] + shift[ct:], 0.0)
    o_ref[...] = y3 + y5


def _pick_tile_c(C_out, K, NL, x_bytes, budget_bytes):
    """Largest multiple-of-8 divisor of C_out fitting the VMEM budget;
    prefer >=2 tiles so the parallel grid axis can use both v7x TensorCores."""
    if C_out % 8 != 0:
        return C_out                                  # single full-extent tile
    cands = sorted((d for d in range(8, C_out + 1, 8) if C_out % d == 0),
                   reverse=True)

    def vmem_est(tc):
        x_b = K * NL * x_bytes                        # resident im2col block
        w_b = 2 * (2 * tc) * K * x_bytes              # double-buffered weights
        o_b = 2 * tc * NL * 4                         # double-buffered output
        acc_b = (2 * tc) * NL * 4                     # f32 accumulator
        tmp_b = tc * NL * 4                           # branch temporaries
        return x_b + w_b + o_b + acc_b + tmp_b

    fits = [d for d in cands if vmem_est(d) <= budget_bytes]
    if not fits:
        # TODO(synk): huge N*L -> needs NL tiling with accumulated moments.
        return min(cands)
    multi = [d for d in fits if C_out // d >= 2]
    return multi[0] if multi else fits[0]


def conv_kernel_extractor(x, params, compute_dtype=jnp.float32):
    """x: (N, C_in, L) float32 -> (N, C_out, L) float32 (training-mode BN)."""
    N, C_in, L = x.shape
    C_out = params["w3"].shape[0]
    K = C_in * 5
    NL = N * L
    x_bytes = jnp.dtype(compute_dtype).itemsize

    budget = 48 << 20                 # conservative per-core budget (v7x: 64 MiB VMEM)
    tile_c = _pick_tile_c(C_out, K, NL, x_bytes, budget)
    n_tiles = C_out // tile_c

    # ---- im2col with NO transpose of the 5x-inflated buffer ----
    # Transpose the raw input once (1x traffic); every tap slice is then already
    # in (C_in, N, L) order, so the stacked buffer reshapes straight to (K, N*L).
    xt = jnp.transpose(x, (1, 0, 2))                             # (C_in, N, L)
    xt_pad = jnp.pad(xt, ((0, 0), (0, 0), (2, 2)))               # (C_in, N, L+4)
    cols = jnp.stack([xt_pad[:, :, t:t + L] for t in range(5)], axis=1)
    x_col = cols.reshape(K, NL).astype(compute_dtype)            # row index = c*5 + t

    # ---- fused / tile-grouped weights (k=3 taps sit at tap positions 1..3) ----
    w3p = jnp.pad(params["w3"], ((0, 0), (0, 0), (1, 1))).reshape(C_out, K)
    w5f = params["w5"].reshape(C_out, K)

    def arrange_rows(p3, p5):
        # Stack branches, then regroup so each C_out tile's rows are contiguous:
        # row = tile*2*tile_c + branch*tile_c + local_channel.
        p = jnp.stack([p3, p5], axis=0)                          # (2, C_out, ...)
        p = p.reshape((2, n_tiles, tile_c) + p.shape[2:])
        p = jnp.swapaxes(p, 0, 1)                                # (n_tiles, 2, tile_c, ...)
        return p.reshape((2 * C_out,) + p.shape[3:])

    w_f = arrange_rows(w3p, w5f).astype(compute_dtype)           # (2*C_out, K)
    g_f = arrange_rows(params["g3"].reshape(C_out), params["g5"].reshape(C_out))
    be_f = arrange_rows(params["beta3"].reshape(C_out), params["beta5"].reshape(C_out))
    gb_f = jnp.stack([g_f, be_f], axis=1).astype(jnp.float32)    # (2*C_out, 2)
    # NOTE: conv biases b3/b5 are deliberately NOT passed -- they cancel exactly
    # under training-mode BatchNorm (they only shift the batch mean).

    est_vmem = (K * NL * x_bytes + 2 * (2 * tile_c) * K * x_bytes
                + 2 * tile_c * NL * 4 + (2 * tile_c) * NL * 4 + tile_c * NL * 4)
    vmem_limit = int(min(64 << 20, max(32 << 20, est_vmem * 3 // 2)))

    cost = pl.CostEstimate(
        flops=2 * C_out * (3 + 5) * C_in * NL,                   # useful taps only
        transcendentals=2 * C_out,                               # one rsqrt per row
        bytes_accessed=(x_bytes * (K * NL + 2 * C_out * K)
                        + 4 * (2 * C_out * 2) + 4 * C_out * NL),
    )

    out_flat = pl.pallas_call(
        _conv_bn_relu_add_kernel,
        out_shape=jax.ShapeDtypeStruct((C_out, NL), jnp.float32),
        grid_spec=pltpu.PrefetchScalarGridSpec(
            num_scalar_prefetch=0,
            grid=(n_tiles,),
            in_specs=[
                pl.BlockSpec((K, NL), lambda i: (0, 0)),             # im2col (resident)
                pl.BlockSpec((2 * tile_c, K), lambda i: (i, 0)),     # fused weights
                pl.BlockSpec((2 * tile_c, 2), lambda i: (i, 0)),     # gamma | beta
            ],
            out_specs=pl.BlockSpec((tile_c, NL), lambda i: (i, 0)),
        ),
        compiler_params=pltpu.CompilerParams(
            dimension_semantics=("parallel",),
            vmem_limit_bytes=vmem_limit,
        ),
        cost_estimate=cost,
    )(x_col, w_f, gb_f)

    # Cheap layout plumbing back to PyTorch's (N, C_out, L), done by XLA.
    return out_flat.reshape(C_out, N, L).transpose(1, 0, 2)


def _reference(x, params):
    """Pure-JAX reference reproducing the PyTorch forward (training-mode BN)."""
    def conv1d(x, w, b, pad):
        out = jax.lax.conv_general_dilated(
            x, w, window_strides=(1,), padding=[(pad, pad)],
            dimension_numbers=("NCH", "OIH", "NCH"))
        return out + b.reshape(1, -1, 1)

    def bn_relu(y, g, be):
        mean = jnp.mean(y, axis=(0, 2), keepdims=True)
        var = jnp.mean((y - mean) ** 2, axis=(0, 2), keepdims=True)
        z = (y - mean) / jnp.sqrt(var + EPS) * g.reshape(1, -1, 1) \
            + be.reshape(1, -1, 1)
        return jnp.maximum(z, 0.0)

    x3 = bn_relu(conv1d(x, params["w3"], params["b3"], 1),
                 params["g3"], params["beta3"])
    x5 = bn_relu(conv1d(x, params["w5"], params["b5"], 2),
                 params["g5"], params["beta5"])
    return x3 + x5


def make_params(key, in_channels, out_channels):
    ks = jax.random.split(key, 8)
    scale = 0.2
    return {
        "w3": scale * jax.random.normal(ks[0], (out_channels, in_channels, 3), jnp.float32),
        "b3": scale * jax.random.normal(ks[1], (out_channels, 1, 1), jnp.float32),
        "w5": scale * jax.random.normal(ks[2], (out_channels, in_channels, 5), jnp.float32),
        "b5": scale * jax.random.normal(ks[3], (out_channels, 1, 1), jnp.float32),
        "g3": 1.0 + 0.1 * jax.random.normal(ks[4], (out_channels, 1, 1), jnp.float32),
        "beta3": 0.1 * jax.random.normal(ks[5], (out_channels, 1, 1), jnp.float32),
        "g5": 1.0 + 0.1 * jax.random.normal(ks[6], (out_channels, 1, 1), jnp.float32),
        "beta5": 0.1 * jax.random.normal(ks[7], (out_channels, 1, 1), jnp.float32),
    }


if __name__ == "__main__":
    N, C_in, C_out, L = 2, 4, 8, 16
    key = jax.random.PRNGKey(0)
    kx, kp = jax.random.split(key)
    x = jax.random.normal(kx, (N, C_in, L), jnp.float32)
    params = make_params(kp, C_in, C_out)

    ref = jax.block_until_ready(_reference(x, params))

    # f32 path: exact-semantics check against the PyTorch-equivalent reference.
    out = jax.block_until_ready(conv_kernel_extractor(x, params))
    assert out.shape == (N, C_out, L)
    assert jnp.allclose(out, ref, atol=1e-4, rtol=1e-4), (
        f"f32 max abs err {jnp.max(jnp.abs(out - ref))}")

    # bf16 im2col / weights (halves dominant HBM+VMEM traffic; f32 accumulation
    # and f32 BN math retained) -- smoke-checked at bf16-appropriate tolerance.
    out_bf16 = jax.block_until_ready(
        conv_kernel_extractor(x, params, compute_dtype=jnp.bfloat16))
    assert out_bf16.shape == (N, C_out, L)
    assert jnp.allclose(out_bf16, ref, atol=1e-1, rtol=1e-1), (
        f"bf16 max abs err {jnp.max(jnp.abs(out_bf16 - ref))}")

    print("KERNEL_OK")
</pallas_src>

<mosaic_0001>
module attributes {stable_mosaic.version = 11 : i64} {
  func.func @_conv_bn_relu_add_kernel(%arg0: i32, %arg1: memref<20x32xf32, #tpu.memory_space<vmem>>, %arg2: memref<16x20xf32, #tpu.memory_space<vmem>>, %arg3: memref<16x2xf32, #tpu.memory_space<vmem>>, %arg4: memref<8x32xf32, #tpu.memory_space<vmem>>) attributes {dimension_semantics = [#tpu.dimension_semantics<parallel>], iteration_bounds = array<i64: 1>, scalar_prefetch = 0 : i64, scratch_operands = 0 : i64, tpu.core_type = #tpu.core_type<tc>, window_params = [{pipeline_mode = #tpu.pipeline_mode<synchronous>, transform_indices = @transform_0, window_bounds = array<i64: 20, 32>}, {transform_indices = @transform_1, window_bounds = array<i64: 16, 20>}, {transform_indices = @transform_2, window_bounds = array<i64: 16, 2>}, {transform_indices = @transform_3, window_bounds = array<i64: 8, 32>}]} {
    %c0 = arith.constant 0 : index
    %c0_0 = arith.constant 0 : index
    %0 = vector.load %arg1[%c0, %c0_0] : memref<20x32xf32, #tpu.memory_space<vmem>>, vector<20x32xf32>
    %c0_1 = arith.constant 0 : index
    %c0_2 = arith.constant 0 : index
    %1 = vector.load %arg2[%c0_1, %c0_2] : memref<16x20xf32, #tpu.memory_space<vmem>>, vector<16x20xf32>
    %cst = arith.constant dense<0.000000e+00> : vector<16x32xf32>
    %2 = tpu.matmul %1, %0, %cst {dimension_numbers = #tpu.dot_dimension_numbers<[1], [0], [0], [1], [0, 0, 1, 1], [], []>} : vector<16x20xf32>, vector<20x32xf32>, vector<16x32xf32> -> vector<16x32xf32>
    %cst_3 = arith.constant dense<0.000000e+00> : vector<16xf32>
    %3 = vector.multi_reduction <add>, %2, %cst_3 [1] : vector<16x32xf32> to vector<16xf32>
    %4 = vector.shape_cast %3 : vector<16xf32> to vector<16x1xf32>
    %cst_4 = arith.constant 3.125000e-02 : f32
    %5 = vector.broadcast %cst_4 : f32 to vector<16x1xf32>
    %6 = arith.mulf %4, %5 : vector<16x1xf32>
    %7 = arith.mulf %2, %2 : vector<16x32xf32>
    %cst_5 = arith.constant dense<0.000000e+00> : vector<16xf32>
    %8 = vector.multi_reduction <add>, %7, %cst_5 [1] : vector<16x32xf32> to vector<16xf32>
    %9 = vector.shape_cast %8 : vector<16xf32> to vector<16x1xf32>
    %cst_6 = arith.constant 3.125000e-02 : f32
    %10 = vector.broadcast %cst_6 : f32 to vector<16x1xf32>
    %11 = arith.mulf %9, %10 : vector<16x1xf32>
    %12 = arith.mulf %6, %6 : vector<16x1xf32>
    %13 = arith.subf %11, %12 : vector<16x1xf32>
    %c0_7 = arith.constant 0 : index
    %c0_8 = arith.constant 0 : index
    %14 = vector.load %arg3[%c0_7, %c0_8] : memref<16x2xf32, #tpu.memory_space<vmem>>, vector<16x1xf32>
    %c0_9 = arith.constant 0 : index
    %c1 = arith.constant 1 : index
    %15 = vector.load %arg3[%c0_9, %c1] : memref<16x2xf32, #tpu.memory_space<vmem>>, vector<16x1xf32>
    %cst_10 = arith.constant 9.99999974E-6 : f32
    %16 = vector.broadcast %cst_10 : f32 to vector<16x1xf32>
    %17 = arith.addf %13, %16 : vector<16x1xf32>
    %18 = math.rsqrt %17 : vector<16x1xf32>
    %19 = arith.mulf %14, %18 : vector<16x1xf32>
    %20 = arith.mulf %6, %19 : vector<16x1xf32>
    %21 = arith.subf %15, %20 : vector<16x1xf32>
    %22 = vector.extract_strided_slice %2 {offsets = [0, 0], sizes = [8, 32], strides = [1, 1]} : vector<16x32xf32> to vector<8x32xf32>
    %23 = vector.extract_strided_slice %19 {offsets = [0, 0], sizes = [8, 1], strides = [1, 1]} : vector<16x1xf32> to vector<8x1xf32>
    %24 = vector.broadcast %23 : vector<8x1xf32> to vector<8x32xf32>
    %25 = arith.mulf %22, %24 : vector<8x32xf32>
    %26 = vector.extract_strided_slice %21 {offsets = [0, 0], sizes = [8, 1], strides = [1, 1]} : vector<16x1xf32> to vector<8x1xf32>
    %27 = vector.broadcast %26 : vector<8x1xf32> to vector<8x32xf32>
    %28 = arith.addf %25, %27 : vector<8x32xf32>
    %cst_11 = arith.constant 0.000000e+00 : f32
    %29 = vector.broadcast %cst_11 : f32 to vector<8x32xf32>
    %30 = arith.maximumf %28, %29 : vector<8x32xf32>
    %31 = vector.extract_strided_slice %2 {offsets = [8, 0], sizes = [8, 32], strides = [1, 1]} : vector<16x32xf32> to vector<8x32xf32>
    %32 = vector.extract_strided_slice %19 {offsets = [8, 0], sizes = [8, 1], strides = [1, 1]} : vector<16x1xf32> to vector<8x1xf32>
    %33 = vector.broadcast %32 : vector<8x1xf32> to vector<8x32xf32>
    %34 = arith.mulf %31, %33 : vector<8x32xf32>
    %35 = vector.extract_strided_slice %21 {offsets = [8, 0], sizes = [8, 1], strides = [1, 1]} : vector<16x1xf32> to vector<8x1xf32>
    %36 = vector.broadcast %35 : vector<8x1xf32> to vector<8x32xf32>
    %37 = arith.addf %34, %36 : vector<8x32xf32>
    %cst_12 = arith.constant 0.000000e+00 : f32
    %38 = vector.broadcast %cst_12 : f32 to vector<8x32xf32>
    %39 = arith.maximumf %37, %38 : vector<8x32xf32>
    %40 = arith.addf %30, %39 : vector<8x32xf32>
    %c0_13 = arith.constant 0 : index
    %c0_14 = arith.constant 0 : index
    %41 = vector.load %arg4[%c0_13, %c0_14] : memref<8x32xf32, #tpu.memory_space<vmem>>, vector<8x32xf32>
    tpu.vector_store %arg4[%c0_13, %c0_14], %40 {strides = array<i32>} : memref<8x32xf32, #tpu.memory_space<vmem>>, vector<8x32xf32>,
    return
  }
  func.func @transform_0(%arg0: i32) -> (i32, i32) {
    %c0_i32 = arith.constant 0 : i32
    %c0_i32_0 = arith.constant 0 : i32
    %c0_i32_1 = arith.constant 0 : i32
    return %c0_i32, %c0_i32_0 : i32, i32
  }
  func.func @transform_1(%arg0: i32) -> (i32, i32) {
    %c0_i32 = arith.constant 0 : i32
    %c0_i32_0 = arith.constant 0 : i32
    return %arg0, %c0_i32 : i32, i32
  }
  func.func @transform_2(%arg0: i32) -> (i32, i32) {
    %c0_i32 = arith.constant 0 : i32
    %c0_i32_0 = arith.constant 0 : i32
    return %arg0, %c0_i32 : i32, i32
  }
  func.func @transform_3(%arg0: i32) -> (i32, i32) {
    %c0_i32 = arith.constant 0 : i32
    %c0_i32_0 = arith.constant 0 : i32
    return %arg0, %c0_i32 : i32, i32
  }
}

</mosaic_0001>

<bundles_post_ra>
// kernel: tpu_custom_call.1
= control target key start
LH: loop header
LB: loop body
LE: loop exit
PB: predicated region body
PF: predicated region fallthrough
CT: control target
= control target key end

     0   :  { %8 = vsyncpa [#allocation3], 0  ;;  %s357_s0 = inlined_call_operand.hbm [shape: f32[20,32], index: 0, kind: input, shape index: {}]   ;;  %s358_s1 = inlined_call_operand.vmem [shape: f32[16,20], index: 1, kind: input, shape index: {}]   ;;  %s359_s2 = inlined_call_operand.vmem [shape: f32[16,2], index: 2, kind: input, shape index: {}]   ;;  %s360_s3 = inlined_call_operand.hbm [shape: f32[8,32], index: 3, kind: output, shape index: {}]  }
   0x1   :  { %9 = vsyncpa [#allocation4], 0  ;;  %s289_s12 = smov [#allocation2]   ;;  %s241_s16 = scalar_lea.hbm %s357_s0, 384 }
   0x2   :  { %s15_s13 = sshll.u32 %s289_s12, 4  ;;  %p242_p0 = scmp.ne.s32.totalorder %s357_s0, %s241_s16  ;;  %s16_s13 = int_to_ptr.vmem [resolvable:$true] %s15_s13 }
   0x3   :  { %p245_p1 = scmp.lt.u32.totalorder %s241_s16, %s357_s0 }
   0x5   :  { %p247_p2 = pnand %p245_p1, %p242_p0 }
   0x7   :  { %250 = shalt.err (!%p247_p2)
}
   0x8   :  { %s251_s21 = scalar_lea.vmem %s16_s13, 384  ;;  %p256_p4 = scmp.lt.s32.totalorder %s16_s13, %s16_s13 }
   0x9   :  { %p252_p3 = scmp.ne.s32.totalorder %s16_s13, %s251_s21  ;;  %p257_p5 = scmp.lt.s32.totalorder %s251_s21, %s251_s21 }
   0xb   :  { %p258_p6 = por %p257_p5, %p256_p4 }
   0xd   :  { %p259_p7 = pnand %p258_p6, %p252_p3 }
   0xf   :  { %262 = shalt.err (!%p259_p7)
}
  0x10   :  { %s290_s22 = smov 128   ;;  %s291_s23 = smov 8  }
  0x11   :  { %21 = dma.hbm_to_vmem [thread:$0]  %s357_s0, 384, %s16_s13, [#allocation3], %s290_s22, %s290_s22, %s291_s23  }
  0x12   :  { %285 = dma.done.wait [#allocation3], 384  }
  0x13   :  { %286 = vsyncadd [#allocation3], 4294966912  ;;  %vm34_vm0 = vcmask 162816   ;;  %v29_v0 = vld [vmem:[#allocation2] sm:$0xff]  ;;  %v30_v1 = vld [vmem:[#allocation2 + $0x8] sm:$0xff]  ;;  %vm41_vm1 = vcmask 1043456  }
  0x14   :  { %v223_v2 = vpack.c.bf16 %v30_v1, %v29_v0  ;;  %v32_v3 = vld [vmem:[%s358_s1] sm:$0xff]  ;;  %v31_v4 = vld [vmem:[#allocation2 + $0x10] sm:$0xf]  ;;  %v33_v5 = vld [vmem:[%s358_s1 + $0x8] sm:$0xff]  ;;  %vm120_vm2 = vcmask 261120   ;;  %v292_v14 = vmov 0  }
  0x15   :  { %220 = vmatprep.mubr.msk.f32.mxu0 %vm34_vm0, %v32_v3  ;;  %234 = vset.pattern.permute.xlu1 %v292_v14  ;;  %v293_v29 = vmov 1   ;;  %v143_v30 = vld [vmem:[%s359_s2] sm:$0xff]  ;;  %v144_v33 = vld [vmem:[%s359_s2 + $0x8] sm:$0xff]  ;;  %s294_s5 = smov 1   ;;  %s295_s2 = smov [#allocation5]  }
  0x16   :  { %224 = vmatprep.subr.bf16.mxu0 %v223_v2  ;;  %235 = vset.pattern.permute.xlu0 %v293_v29  ;;  %s197_s6 = sshll.u32 %s295_s2, 4  ;;  %s198_s6 = int_to_ptr.vmem [resolvable:$true] %s197_s6 }
  0x17   :  { %226 = vmatpush3.bf16.msra.mxu0 %v223_v2  ;;  %s263_s7 = scalar_lea.vmem %s198_s6, 128  ;;  %p268_p9 = scmp.lt.s32.totalorder %s198_s6, %s198_s6 }
  0x18   :  { %218 = vmatprep.subr.msk.mxu0 %vm41_vm1, %v31_v4  ;;  %p264_p8 = scmp.ne.s32.totalorder %s198_s6, %s263_s7  ;;  %p269_p10 = scmp.lt.s32.totalorder %s263_s7, %s263_s7 }
  0x1a   :  { %p270_p11 = por %p269_p10, %p268_p9 }
  0x1b   :  { %219 = vmatpush3.msk.msra.mxu0 %vm41_vm1, %v31_v4 }
  0x1c   :  { %221 = vmatmul.mubr.msk.f32.vlgmr.msra.gmra.mrb[0].mxu0 %vm34_vm0, %v33_v5  ;;  %p271_p12 = pnand %p270_p11, %p264_p8 }
  0xef   :  { %v222_v6 = vpop.f32.mrb[0].mxu0 }
  0xf0   :  { %v111_v7 = vpop.f32.mrb[1].mxu0  ;;  %v130_v11 = vmul.f32 %v222_v6, %v222_v6  ;;  %v124_v12 = vsel %vm120_vm2, %v222_v6, 0.0 }
  0xf1   :  { %v121_v8 = vsel %vm120_vm2, %v111_v7, 0.0  ;;  %v129_v9 = vmul.f32 %v111_v7, %v111_v7 }
  0xf2   :  { %122 = vadd.xlane.f32.xlu0 %v121_v8  ;;  %v134_v13 = vsel %vm120_vm2, %v130_v11, 0.0 }
  0xf3   :  { %v131_v10 = vsel %vm120_vm2, %v129_v9, 0.0 }
  0xf4   :  { %132 = vadd.xlane.f32.xlu1 %v131_v10 }
  0xf6   :  { %125 = vadd.xlane.f32.xlu0 %v124_v12 }
  0xf8   :  { %135 = vadd.xlane.f32.xlu1 %v134_v13 }
 0x17f   :  { %v123_v15 = vpop.xlane.xlu0 %122 }
 0x180   :  { %v127_v16 = vmul.f32 0.03125, %v123_v15 }
 0x181   :  { %v133_v17 = vpop.xlane.xlu1 %132 }
 0x182   :  { %v139_v18 = vmul.f32 %v127_v16, %v127_v16  ;;  %v137_v19 = vmul.f32 0.03125, %v133_v17 }
 0x183   :  { %v126_v20 = vpop.xlane.xlu0 %125 }
 0x184   :  { %v141_v21 = vsub.f32 %v137_v19, %v139_v18  ;;  %v128_v22 = vmul.f32 0.03125, %v126_v20 }
 0x185   :  { %v136_v23 = vpop.xlane.xlu1 %135 }
 0x186   :  { %v145_v24 = vadd.f32 1e-05, %v141_v21  ;;  %v140_v25 = vmul.f32 %v128_v22, %v128_v22  ;;  %v138_v26 = vmul.f32 0.03125, %v136_v23 }
 0x188   :  { %237 = vrsqrt.f32 %v145_v24  ;;  %v142_v27 = vsub.f32 %v138_v26, %v140_v25 }
 0x18a   :  { %v146_v28 = vadd.f32 1e-05, %v142_v27 }
 0x18c   :  { %239 = vrsqrt.f32 %v146_v28 }
 0x192   :  { %v238_v31 = vpop.eup %237 }
 0x193   :  { %v149_v32 = vmul.f32 %v238_v31, %v143_v30 }
 0x195   :  { %v151_v34 = vmul.f32 %v149_v32, %v127_v16 }
 0x196   :  { %v240_v35 = vpop.eup %239 }
 0x197   :  { %155 = vrot.lane.b32.xlu0 %v151_v34, %s294_s5  ;;  %v150_v36 = vmul.f32 %v240_v35, %v144_v33 }
 0x199   :  { %v152_v37 = vmul.f32 %v150_v36, %v128_v22 }
 0x19b   :  { %157 = vrot.lane.b32.xlu1 %v152_v37, %s294_s5 }
 0x19f   :  { %165 = vperm.xlu1 %234, %v149_v32  }
 0x1a3   :  { %178 = vperm.xlu1 %234, %v150_v36  }
 0x1a7   :  { %236 = vset.pattern.permute.xlu1 %v293_v29 }
 0x209   :  { %v156_v38 = vpop.permute.xlu0 %155 }
 0x20a   :  { %v161_v39 = vsub.f32 %v143_v30, %v156_v38 }
 0x20c   :  { %171 = vperm.xlu0 %235, %v161_v39  }
 0x20d   :  { %v158_v40 = vpop.permute.xlu1 %157 }
 0x20e   :  { %v162_v41 = vsub.f32 %v144_v33, %v158_v40 }
 0x210   :  { %184 = vperm.xlu1 %236, %v162_v41  }
 0x21e   :  { %v166_v42 = vpop.permute.xlu1 %165 }
 0x21f   :  { %v168_v45 = vmul.f32 %v166_v42, %v111_v7 }
 0x222   :  { %v179_v43 = vpop.permute.xlu1 %178 }
 0x223   :  { %v181_v46 = vmul.f32 %v222_v6, %v179_v43 }
 0x28b   :  { %v172_v44 = vpop.permute.xlu0 %171 }
 0x28c   :  { %v174_v47 = vadd.f32 %v172_v44, %v168_v45 }
 0x28e   :  { %v175_v50 = vmax.f32 %v174_v47, 0.0 }
 0x28f   :  { %v185_v48 = vpop.permute.xlu1 %184 }
 0x290   :  { %v187_v49 = vadd.f32 %v185_v48, %v181_v46 }
 0x292   :  { %v188_v51 = vmax.f32 %v187_v49, 0.0 }
 0x294   :  { %v189_v52 = vadd.f32 %v188_v51, %v175_v50 }
 0x296   :  { %190 = vst.msk [vmem:[#allocation5] sm:$0xff] %vm120_vm2, %v189_v52 }
 0x297   :  { %274 = shalt.err (!%p271_p12)
}
 0x298   :  { %s275_s10 = scalar_lea.hbm %s360_s3, 128 }
 0x299   :  { %p276_p13 = scmp.ne.s32.totalorder %s360_s3, %s275_s10  ;;  %p279_p0 = scmp.lt.u32.totalorder %s275_s10, %s360_s3 }
 0x29b   :  { %p281_p1 = pnand %p279_p0, %p276_p13 }
 0x29d   :  { %284 = shalt.err (!%p281_p1)
}
 0x29e   :  { %200 = dma.vmem_to_hbm [thread:$0]  %s198_s6, 128, %s360_s3, [#allocation4]  }
 0x29f   :  { %287 = dma.done.wait [#allocation4], 128  }
 0x2a0   :  { %288 = vsyncadd [#allocation4], 4294967168 }
 0x2a1   :  { %204 = vsyncpa [#allocation3], 1 }
 0x2a2   :  { %205 = vsyncpa [#allocation4], 1 }

</bundles_post_ra>
